<compile_context>
chip_gen: v6e
topology: v6e:2x2x1
jax: 0.10.0
libtpu: 0.0.40
codegen_flags: <defaults>
</compile_context>

<pallas_src>
import functools

import jax
import jax.numpy as jnp
import numpy as np
from jax import lax
from jax.experimental import pallas as pl
from jax.experimental.pallas import tpu as pltpu


def _sinkhorn_kernel(dis_ref, tm_ref, pd_ref, f_out_ref, g_out_ref, *,
                     sigma, m_true, max_updates):
    sig = jnp.float32(sigma)
    neg_inv_sig = jnp.float32(-1.0 / sigma)
    inv_1p_sig = jnp.float32(1.0 / (1.0 + sigma))
    eps = jnp.float32(1e-7)
    thresh = jnp.float32(5.0 * 1e-4)
    inv_m = jnp.float32(1.0 / m_true)

    dis = dis_ref[...]                                        # (Mp, Np) f32
    # One-time O(M*N) work: Sinkhorn kernel matrix in BOTH orientations, kept
    # bf16 so every per-iteration matvec is a single-pass, natural-orientation
    # MXU op (f32 accumulation via preferred_element_type).
    E = jnp.exp(dis * neg_inv_sig).astype(jnp.bfloat16)       # (Mp, Np)
    E_T = jnp.exp(dis.T * neg_inv_sig).astype(jnp.bfloat16)   # (Np, Mp)

    tm = tm_ref[...]                                          # (1, Mp) f32
    pd = pd_ref[...]                                          # (1, Np) f32
    Mp = tm.shape[1]

    # Padded rows must not contribute to the convergence mean.
    row_mask = (lax.broadcasted_iota(jnp.int32, (1, Mp), 1) < m_true)
    row_mask = row_mask.astype(jnp.float32)

    def one_update(u):
        # u = exp(g) * target_mass, shape (1, Mp)
        s = lax.dot_general(
            u.astype(jnp.bfloat16), E,
            dimension_numbers=(((1,), (0,)), ((), ())),
            preferred_element_type=jnp.float32)               # (1, Np)
        f_new = -jnp.log(s + eps) * inv_1p_sig
        v = jnp.exp(f_new) * pd                               # (1, Np)
        s2 = lax.dot_general(
            v.astype(jnp.bfloat16), E_T,
            dimension_numbers=(((1,), (0,)), ((), ())),
            preferred_element_type=jnp.float32)               # (1, Mp)
        # exp(g_new) == 1/(s2+eps); keep the log only for diff/output (it is
        # off the critical path to the next matvec).
        u_new = tm * pl.reciprocal(s2 + eps, approx=True)
        g_new = -jnp.log(s2 + eps)
        return u_new, f_new, g_new

    n_chunks = max_updates // 2

    def cond(carry):
        i, _, _, _, diff = carry
        return jnp.logical_and(i < n_chunks, diff >= thresh)

    def body(carry):
        i, u, _, g_prev, _ = carry
        # Two Sinkhorn updates per convergence check: amortizes the cross-lane
        # reduce -> scalar -> branch that serializes the loop.
        u1, f1, g1 = one_update(u)
        u2, f2, g2 = one_update(u1)
        d1 = sig * jnp.sum(jnp.abs(g1 - g_prev) * row_mask) * inv_m
        d2 = sig * jnp.sum(jnp.abs(g2 - g1) * row_mask) * inv_m
        diff = jnp.minimum(d1, d2)   # stop if either update already converged
        return i + 1, u2, f2, g2, diff

    u0 = tm                                  # g0 == 0  =>  exp(g0)*tm == tm
    f0 = jnp.zeros_like(pd)
    g0 = jnp.zeros_like(tm)
    carry0 = (jnp.int32(0), u0, f0, g0, jnp.float32(jnp.inf))
    _, _, f, g, _ = lax.while_loop(cond, body, carry0)

    f_out_ref[...] = 1.0 - jnp.exp(-(f * sig))               # (1, Np) lane-dense
    g_out_ref[...] = g * sig                                  # (1, Mp) lane-dense


def _round_up(x, m):
    return ((x + m - 1) // m) * m


def weight_vec_ent_sink(dis_mtx_cross, pre_density, target_mass, sigma,
                        max_updates=100):
    """Returns (f_cross: (N,), g_cross: (M,)) matching the torch forward."""
    dis = jnp.asarray(dis_mtx_cross, jnp.float32)
    M, N = dis.shape
    Mp, Np = _round_up(M, 128), _round_up(N, 128)

    # Zero-pad: padded rows/cols get tm/pd == 0, so they contribute exactly 0
    # to both matvecs; the convergence mean and the outputs exclude them.
    dis_p = jnp.pad(dis, ((0, Mp - M), (0, Np - N)))
    tm_p = jnp.pad(jnp.asarray(target_mass, jnp.float32).reshape(1, M),
                   ((0, 0), (0, Mp - M)))
    pd_p = jnp.pad(jnp.asarray(pre_density, jnp.float32).reshape(1, N),
                   ((0, 0), (0, Np - N)))

    # Chip-aware VMEM budget: f32 dis block + bf16 E + bf16 E^T + transient
    # f32 exp temp + slack, clamped below the physical VMEM of this chip
    # (v7x has only 64 MiB).
    mat = Mp * Np
    need = mat * 16 + (1 << 20)
    try:
        cap = int(pltpu.get_tpu_info().vmem_capacity_bytes)
    except Exception:
        cap = 64 * 1024 * 1024
    vmem_limit = int(min(cap - 8 * 1024 * 1024,
                         max(32 * 1024 * 1024, need)))

    kernel = functools.partial(_sinkhorn_kernel, sigma=float(sigma),
                               m_true=int(M), max_updates=int(max_updates))
    f2d, g2d = pl.pallas_call(
        kernel,
        out_shape=(
            jax.ShapeDtypeStruct((1, Np), jnp.float32),
            jax.ShapeDtypeStruct((1, Mp), jnp.float32),
        ),
        in_specs=[
            pl.BlockSpec((Mp, Np), lambda: (0, 0)),
            pl.BlockSpec((1, Mp), lambda: (0, 0)),
            pl.BlockSpec((1, Np), lambda: (0, 0)),
        ],
        out_specs=(
            pl.BlockSpec((1, Np), lambda: (0, 0)),
            pl.BlockSpec((1, Mp), lambda: (0, 0)),
        ),
        compiler_params=pltpu.CompilerParams(vmem_limit_bytes=vmem_limit),
    )(dis_p, tm_p, pd_p)
    return f2d[0, :N], g2d[0, :M]


def _reference_numpy(dis_mtx_cross, pre_density, target_mass, sigma):
    """Direct float32 numpy transcription of the torch forward (with break)."""
    dis = np.asarray(dis_mtx_cross, np.float32) / np.float32(sigma)
    M, N = dis.shape
    pd = np.asarray(pre_density, np.float32)
    tm = np.asarray(target_mass, np.float32)
    g = np.zeros(M, np.float32)
    f = np.zeros(N, np.float32)
    for _ in range(100):
        g_pre = g
        s = np.sum(np.exp(-(dis - g[:, None])) * tm[:, None], axis=0)
        f = (-np.log(s + 1e-7)) / np.float32(1.0 + sigma)
        s2 = np.sum(np.exp(-(dis.T - f[:, None])) * pd[:, None], axis=0)
        g = -np.log(s2 + 1e-7)
        if sigma * np.mean(np.abs(g - g_pre)) < 5 * 0.0001:
            break
    g = g * np.float32(sigma)
    f = f * np.float32(sigma)
    f = -np.exp(-f) + 1.0
    return f, g


if __name__ == "__main__":
    M, N = 64, 128
    sigma = 1.0

    key = jax.random.PRNGKey(0)
    k1, k2, k3 = jax.random.split(key, 3)
    dis_mtx_cross = jax.random.uniform(k1, (M, N), dtype=jnp.float32)
    target_mass = jax.nn.softmax(jax.random.normal(k2, (M,), dtype=jnp.float32))
    pre_density = jax.nn.softmax(jax.random.normal(k3, (N,), dtype=jnp.float32))

    f_cross, g_cross = weight_vec_ent_sink(dis_mtx_cross, pre_density,
                                           target_mass, sigma)
    jax.block_until_ready((f_cross, g_cross))

    # sanity check against a plain numpy transcription of the torch forward
    f_ref, g_ref = _reference_numpy(np.asarray(dis_mtx_cross),
                                    np.asarray(pre_density),
                                    np.asarray(target_mass), sigma)
    assert np.allclose(np.asarray(f_cross), f_ref, atol=1e-2, rtol=1e-2)
    assert np.allclose(np.asarray(g_cross), g_ref, atol=1e-2, rtol=1e-2)

    print("KERNEL_OK")
</pallas_src>

<mosaic_0001>
module attributes {stable_mosaic.version = 11 : i64} {
  func.func @_sinkhorn_kernel(%arg0: memref<128x128xf32, #tpu.memory_space<vmem>>, %arg1: memref<1x128xf32, #tpu.memory_space<vmem>>, %arg2: memref<1x128xf32, #tpu.memory_space<vmem>>, %arg3: memref<1x128xf32, #tpu.memory_space<vmem>>, %arg4: memref<1x128xf32, #tpu.memory_space<vmem>>) attributes {dimension_semantics = [], scalar_prefetch = 0 : i64, scratch_operands = 0 : i64, tpu.core_type = #tpu.core_type<tc>} {
    %c0 = arith.constant 0 : index
    %c0_0 = arith.constant 0 : index
    %0 = vector.load %arg0[%c0, %c0_0] : memref<128x128xf32, #tpu.memory_space<vmem>>, vector<128x128xf32>
    %cst = arith.constant -1.000000e+00 : f32
    %1 = vector.broadcast %cst : f32 to vector<128x128xf32>
    %2 = arith.mulf %0, %1 : vector<128x128xf32>
    %3 = math.exp %2 : vector<128x128xf32>
    %4 = arith.truncf %3 : vector<128x128xf32> to vector<128x128xbf16>
    %5 = tpu.transpose %0, [1, 0] : vector<128x128xf32> -> vector<128x128xf32>
    %cst_1 = arith.constant -1.000000e+00 : f32
    %6 = vector.broadcast %cst_1 : f32 to vector<128x128xf32>
    %7 = arith.mulf %5, %6 : vector<128x128xf32>
    %8 = math.exp %7 : vector<128x128xf32>
    %9 = arith.truncf %8 : vector<128x128xf32> to vector<128x128xbf16>
    %c0_2 = arith.constant 0 : index
    %c0_3 = arith.constant 0 : index
    %10 = vector.load %arg1[%c0_2, %c0_3] : memref<1x128xf32, #tpu.memory_space<vmem>>, vector<1x128xf32>
    %c0_4 = arith.constant 0 : index
    %c0_5 = arith.constant 0 : index
    %11 = vector.load %arg2[%c0_4, %c0_5] : memref<1x128xf32, #tpu.memory_space<vmem>>, vector<1x128xf32>
    %12 = tpu.iota {dimensions = array<i32: 1>} : vector<1x128xi32>
    %c64_i32 = arith.constant 64 : i32
    %13 = vector.broadcast %c64_i32 : i32 to vector<1x128xi32>
    %14 = arith.cmpi slt, %12, %13 : vector<1x128xi32>
    %15 = arith.extui %14 : vector<1x128xi1> to vector<1x128xi32>
    %16 = arith.sitofp %15 : vector<1x128xi32> to vector<1x128xf32>
    %cst_6 = arith.constant 0.000000e+00 : f32
    %17 = vector.broadcast %cst_6 : f32 to vector<1x128xf32>
    %cst_7 = arith.constant 0.000000e+00 : f32
    %18 = vector.broadcast %cst_7 : f32 to vector<1x128xf32>
    %cst_8 = arith.constant 5.000000e-04 : f32
    %cst_9 = arith.constant 1.000000e-07 : f32
    %cst_10 = arith.constant 5.000000e-01 : f32
    %cst_11 = arith.constant 1.000000e+00 : f32
    %cst_12 = arith.constant 1.562500e-02 : f32
    %c0_i32 = arith.constant 0 : i32
    %cst_13 = arith.constant 0x7F800000 : f32
    %19:5 = scf.while (%arg5 = %c0_i32, %arg6 = %10, %arg7 = %17, %arg8 = %18, %arg9 = %cst_13) : (i32, vector<1x128xf32>, vector<1x128xf32>, vector<1x128xf32>, f32) -> (i32, vector<1x128xf32>, vector<1x128xf32>, vector<1x128xf32>, f32) {
      %c50_i32 = arith.constant 50 : i32
      %31 = arith.cmpi slt, %arg5, %c50_i32 : i32
      %32 = arith.cmpf oge, %arg9, %cst_8 : f32
      %33 = arith.andi %31, %32 : i1
      scf.condition(%33) %arg5, %arg6, %arg7, %arg8, %arg9 : i32, vector<1x128xf32>, vector<1x128xf32>, vector<1x128xf32>, f32
    } do {
    ^bb0(%arg5: i32, %arg6: vector<1x128xf32>, %arg7: vector<1x128xf32>, %arg8: vector<1x128xf32>, %arg9: f32):
      %31 = arith.truncf %arg6 : vector<1x128xf32> to vector<1x128xbf16>
      %cst_22 = arith.constant dense<0.000000e+00> : vector<1x128xf32>
      %32 = tpu.matmul %31, %4, %cst_22 {dimension_numbers = #tpu.dot_dimension_numbers<[1], [0], [0], [1], [0, 0, 1, 1], [], []>} : vector<1x128xbf16>, vector<128x128xbf16>, vector<1x128xf32> -> vector<1x128xf32>
      %33 = vector.broadcast %cst_9 : f32 to vector<1x128xf32>
      %34 = arith.addf %32, %33 : vector<1x128xf32>
      %35 = math.log %34 : vector<1x128xf32>
      %cst_23 = arith.constant 0.000000e+00 : f32
      %36 = vector.broadcast %cst_23 : f32 to vector<1x128xf32>
      %37 = arith.subf %36, %35 : vector<1x128xf32>
      %38 = vector.broadcast %cst_10 : f32 to vector<1x128xf32>
      %39 = arith.mulf %37, %38 : vector<1x128xf32>
      %40 = math.exp %39 : vector<1x128xf32>
      %41 = arith.mulf %40, %11 : vector<1x128xf32>
      %42 = arith.truncf %41 : vector<1x128xf32> to vector<1x128xbf16>
      %cst_24 = arith.constant dense<0.000000e+00> : vector<1x128xf32>
      %43 = tpu.matmul %42, %9, %cst_24 {dimension_numbers = #tpu.dot_dimension_numbers<[1], [0], [0], [1], [0, 0, 1, 1], [], []>} : vector<1x128xbf16>, vector<128x128xbf16>, vector<1x128xf32> -> vector<1x128xf32>
      %44 = vector.broadcast %cst_9 : f32 to vector<1x128xf32>
      %45 = arith.addf %43, %44 : vector<1x128xf32>
      %46 = tpu.reciprocal %45 {approx = true} : vector<1x128xf32> -> vector<1x128xf32>
      %47 = arith.mulf %10, %46 : vector<1x128xf32>
      %48 = vector.broadcast %cst_9 : f32 to vector<1x128xf32>
      %49 = arith.addf %43, %48 : vector<1x128xf32>
      %50 = math.log %49 : vector<1x128xf32>
      %cst_25 = arith.constant 0.000000e+00 : f32
      %51 = vector.broadcast %cst_25 : f32 to vector<1x128xf32>
      %52 = arith.subf %51, %50 : vector<1x128xf32>
      %53 = arith.truncf %47 : vector<1x128xf32> to vector<1x128xbf16>
      %cst_26 = arith.constant dense<0.000000e+00> : vector<1x128xf32>
      %54 = tpu.matmul %53, %4, %cst_26 {dimension_numbers = #tpu.dot_dimension_numbers<[1], [0], [0], [1], [0, 0, 1, 1], [], []>} : vector<1x128xbf16>, vector<128x128xbf16>, vector<1x128xf32> -> vector<1x128xf32>
      %55 = vector.broadcast %cst_9 : f32 to vector<1x128xf32>
      %56 = arith.addf %54, %55 : vector<1x128xf32>
      %57 = math.log %56 : vector<1x128xf32>
      %cst_27 = arith.constant 0.000000e+00 : f32
      %58 = vector.broadcast %cst_27 : f32 to vector<1x128xf32>
      %59 = arith.subf %58, %57 : vector<1x128xf32>
      %60 = vector.broadcast %cst_10 : f32 to vector<1x128xf32>
      %61 = arith.mulf %59, %60 : vector<1x128xf32>
      %62 = math.exp %61 : vector<1x128xf32>
      %63 = arith.mulf %62, %11 : vector<1x128xf32>
      %64 = arith.truncf %63 : vector<1x128xf32> to vector<1x128xbf16>
      %cst_28 = arith.constant dense<0.000000e+00> : vector<1x128xf32>
      %65 = tpu.matmul %64, %9, %cst_28 {dimension_numbers = #tpu.dot_dimension_numbers<[1], [0], [0], [1], [0, 0, 1, 1], [], []>} : vector<1x128xbf16>, vector<128x128xbf16>, vector<1x128xf32> -> vector<1x128xf32>
      %66 = vector.broadcast %cst_9 : f32 to vector<1x128xf32>
      %67 = arith.addf %65, %66 : vector<1x128xf32>
      %68 = tpu.reciprocal %67 {approx = true} : vector<1x128xf32> -> vector<1x128xf32>
      %69 = arith.mulf %10, %68 : vector<1x128xf32>
      %70 = vector.broadcast %cst_9 : f32 to vector<1x128xf32>
      %71 = arith.addf %65, %70 : vector<1x128xf32>
      %72 = math.log %71 : vector<1x128xf32>
      %cst_29 = arith.constant 0.000000e+00 : f32
      %73 = vector.broadcast %cst_29 : f32 to vector<1x128xf32>
      %74 = arith.subf %73, %72 : vector<1x128xf32>
      %75 = arith.subf %52, %arg8 : vector<1x128xf32>
      %76 = math.absf %75 : vector<1x128xf32>
      %77 = arith.mulf %76, %16 : vector<1x128xf32>
      %78 = vector.shape_cast %77 : vector<1x128xf32> to vector<1x1x128xf32>
      %cst_30 = arith.constant dense<0.000000e+00> : vector<1xf32>
      %79 = vector.multi_reduction <add>, %78, %cst_30 [1, 2] : vector<1x1x128xf32> to vector<1xf32>
      %80 = vector.shape_cast %79 : vector<1xf32> to vector<1x1x1xf32>
      %81 = vector.extract %80[0, 0, 0] : f32 from vector<1x1x1xf32>
      %82 = arith.mulf %cst_11, %81 : f32
      %83 = arith.mulf %82, %cst_12 : f32
      %84 = arith.subf %74, %52 : vector<1x128xf32>
      %85 = math.absf %84 : vector<1x128xf32>
      %86 = arith.mulf %85, %16 : vector<1x128xf32>
      %87 = vector.shape_cast %86 : vector<1x128xf32> to vector<1x1x128xf32>
      %cst_31 = arith.constant dense<0.000000e+00> : vector<1xf32>
      %88 = vector.multi_reduction <add>, %87, %cst_31 [1, 2] : vector<1x1x128xf32> to vector<1xf32>
      %89 = vector.shape_cast %88 : vector<1xf32> to vector<1x1x1xf32>
      %90 = vector.extract %89[0, 0, 0] : f32 from vector<1x1x1xf32>
      %91 = arith.mulf %cst_11, %90 : f32
      %92 = arith.mulf %91, %cst_12 : f32
      %93 = arith.minimumf %83, %92 : f32
      %c1_i32 = arith.constant 1 : i32
      %94 = arith.addi %arg5, %c1_i32 : i32
      scf.yield %94, %69, %61, %74, %93 : i32, vector<1x128xf32>, vector<1x128xf32>, vector<1x128xf32>, f32
    }
    %cst_14 = arith.constant 1.000000e+00 : f32
    %20 = vector.broadcast %cst_14 : f32 to vector<1x128xf32>
    %21 = arith.mulf %19#2, %20 : vector<1x128xf32>
    %cst_15 = arith.constant 0.000000e+00 : f32
    %22 = vector.broadcast %cst_15 : f32 to vector<1x128xf32>
    %23 = arith.subf %22, %21 : vector<1x128xf32>
    %24 = math.exp %23 : vector<1x128xf32>
    %cst_16 = arith.constant 1.000000e+00 : f32
    %25 = vector.broadcast %cst_16 : f32 to vector<1x128xf32>
    %26 = arith.subf %25, %24 : vector<1x128xf32>
    %c0_17 = arith.constant 0 : index
    %c0_18 = arith.constant 0 : index
    %27 = vector.load %arg3[%c0_17, %c0_18] : memref<1x128xf32, #tpu.memory_space<vmem>>, vector<1x128xf32>
    tpu.vector_store %arg3[%c0_17, %c0_18], %26 {strides = array<i32>} : memref<1x128xf32, #tpu.memory_space<vmem>>, vector<1x128xf32>,
    %cst_19 = arith.constant 1.000000e+00 : f32
    %28 = vector.broadcast %cst_19 : f32 to vector<1x128xf32>
    %29 = arith.mulf %19#3, %28 : vector<1x128xf32>
    %c0_20 = arith.constant 0 : index
    %c0_21 = arith.constant 0 : index
    %30 = vector.load %arg4[%c0_20, %c0_21] : memref<1x128xf32, #tpu.memory_space<vmem>>, vector<1x128xf32>
    tpu.vector_store %arg4[%c0_20, %c0_21], %29 {strides = array<i32>} : memref<1x128xf32, #tpu.memory_space<vmem>>, vector<1x128xf32>,
    return
  }
}

</mosaic_0001>

<bundles_post_ra>
// kernel: tpu_custom_call.1
= control target key start
LH: loop header
LB: loop body
LE: loop exit
PB: predicated region body
PF: predicated region fallthrough
CT: control target
= control target key end

     0   :  { %10 = vsyncpa [#allocation3], 0  ;;  %s1024_s0 = inlined_call_operand.hbm [shape: f32[128,128], index: 0, kind: input, shape index: {}]   ;;  %s1025_s1 = inlined_call_operand.vmem [shape: f32[1,128], index: 1, kind: input, shape index: {}]   ;;  %s1026_s2 = inlined_call_operand.vmem [shape: f32[1,128], index: 2, kind: input, shape index: {}]   ;;  %s1027_s3 = inlined_call_operand.hbm [shape: f32[1,128], index: 3, kind: output, shape index: {0}]   ;;  %s1028_s4 = inlined_call_operand.hbm [shape: f32[1,128], index: 4, kind: output, shape index: {1}]  }
   0x1   :  { %11 = vsyncpa [#allocation4], 0 }
   0x2   :  { %12 = vsyncpa [#allocation7], 0  ;;  %s808_s15 = smov [#allocation2]  }
   0x3   :  { %s18_s16 = sshll.u32 %s808_s15, 4  ;;  %s19_s16 = int_to_ptr.vmem [resolvable:$true] %s18_s16 }
   0x4   :  { %s726_s17 = scalar_lea.vmem %s19_s16, 2048  ;;  %p731_p1 = scmp.lt.s32.totalorder %s19_s16, %s19_s16 }
   0x5   :  { %p727_p0 = scmp.ne.s32.totalorder %s19_s16, %s726_s17  ;;  %p732_p2 = scmp.lt.s32.totalorder %s726_s17, %s726_s17 }
   0x7   :  { %p733_p3 = por %p732_p2, %p731_p1 }
   0x9   :  { %p734_p4 = pnand %p733_p3, %p727_p0 }
   0xb   :  { %737 = shalt.err (!%p734_p4)
}
   0xc   :  { %s809_s18 = smov 128   ;;  %s810_s19 = smov 8  }
   0xd   :  { %24 = dma.hbm_to_vmem [thread:$0]  %s1024_s0, 2048, %s19_s16, [#allocation3], %s809_s18, %s809_s18, %s810_s19  }
   0xe   :  { %790 = dma.done.wait [#allocation3], 2048  }
   0xf   :  { %791 = vsyncadd [#allocation3], 4294965248  ;;  %v847_v0 = vld [vmem:[%s1025_s1] sm:$0x1]   ;;  %v34_v4 = vld [vmem:[#allocation2 + $0x8] sm:$0xff]  ;;  %s921_s0 = smov 0  }
  0x10   :  { %v852_v1 = vld [vmem:[%s1026_s2] sm:$0x1]  ;;  %v35_v5 = vld [vmem:[#allocation2 + $0x10] sm:$0xff]  ;;  %v36_v6 = vld [vmem:[#allocation2 + $0x18] sm:$0xff]  ;;  %v50_v7 = vmul.f32 -1.0, %v34_v4 }
  0x11   :  { %v33_v2 = vld [vmem:[#allocation2] sm:$0xff]  ;;  %v51_v8 = vmul.f32 -1.0, %v35_v5  ;;  %v52_v9 = vmul.f32 -1.0, %v36_v6  ;;  %v854_v11 = vld [vmem:[#allocation2 + $0x28] sm:$0xff]  ;;  %v856_v12 = vld [vmem:[#allocation2 + $0x30] sm:$0xff] }
  0x12   :  { %v49_v3 = vmul.f32 -1.0, %v33_v2  ;;  %105 = vxpose.xlu0.b32.start [1/16] %v33_v2, 128  ;;  %v37_v10 = vld [vmem:[#allocation2 + $0x20] sm:$0xff]  ;;  %v54_v15 = vmul.f32 -1.0, %v854_v11  ;;  %v55_v16 = vmul.f32 -1.0, %v856_v12  ;;  %v67_v17 = vmul.f32 1.442695, %v50_v7 }
  0x13   :  { %v53_v14 = vmul.f32 -1.0, %v37_v10  ;;  %v69_v18 = vmul.f32 1.442695, %v51_v8  ;;  %v71_v19 = vmul.f32 1.442695, %v52_v9  ;;  %v860_v22 = vld [vmem:[#allocation2 + $0x38] sm:$0xff] }
  0x14   :  { %v65_v13 = vmul.f32 1.442695, %v49_v3  ;;  %v75_v21 = vmul.f32 1.442695, %v54_v15  ;;  %v77_v23 = vmul.f32 1.442695, %v55_v16 }
  0x15   :  { %v73_v20 = vmul.f32 1.442695, %v53_v14  ;;  %v56_v24 = vmul.f32 -1.0, %v860_v22  ;;  %v863_v25 = vld [vmem:[#allocation2 + $0x40] sm:$0xff]  ;;  %v865_v26 = vld [vmem:[#allocation2 + $0x48] sm:$0xff]  ;;  %v867_v27 = vld [vmem:[#allocation2 + $0x50] sm:$0xff] }
  0x16   :  { %636 = vpow2.f32 %v65_v13  ;;  %106 = vxpose.xlu0.b32.cont [2/16] %v34_v4, 128  ;;  %v57_v28 = vmul.f32 -1.0, %v863_v25  ;;  %v58_v29 = vmul.f32 -1.0, %v865_v26  ;;  %v59_v30 = vmul.f32 -1.0, %v867_v27  ;;  %v872_v31 = vld [vmem:[#allocation2 + $0x58] sm:$0xff]  ;;  %v45_v34 = vld [vmem:[#allocation2 + $0x60] sm:$0xff]  ;;  %v46_v37 = vld [vmem:[#allocation2 + $0x68] sm:$0xff] }
  0x17   :  { %638 = vpow2.f32 %v67_v17  ;;  %v79_v32 = vmul.f32 1.442695, %v56_v24  ;;  %v60_v33 = vmul.f32 -1.0, %v872_v31  ;;  %v61_v36 = vmul.f32 -1.0, %v45_v34  ;;  %v47_v40 = vld [vmem:[#allocation2 + $0x70] sm:$0xff]  ;;  %v48_v43 = vld [vmem:[#allocation2 + $0x78] sm:$0xff] }
  0x18   :  { %640 = vpow2.f32 %v69_v18  ;;  %v81_v35 = vmul.f32 1.442695, %v57_v28  ;;  %v83_v38 = vmul.f32 1.442695, %v58_v29  ;;  %v62_v39 = vmul.f32 -1.0, %v46_v37 }
  0x19   :  { %642 = vpow2.f32 %v71_v19  ;;  %v85_v41 = vmul.f32 1.442695, %v59_v30  ;;  %v63_v42 = vmul.f32 -1.0, %v47_v40  ;;  %v87_v44 = vmul.f32 1.442695, %v60_v33 }
  0x1a   :  { %107 = vxpose.xlu0.b32.cont [3/16] %v35_v5, 128  ;;  %644 = vpow2.f32 %v73_v20  ;;  %v64_v45 = vmul.f32 -1.0, %v48_v43  ;;  %v89_v46 = vmul.f32 1.442695, %v61_v36  ;;  %v91_v47 = vmul.f32 1.442695, %v62_v39 }
  0x1b   :  { %646 = vpow2.f32 %v75_v21  ;;  %v93_v48 = vmul.f32 1.442695, %v63_v42  ;;  %v811_v14 = vmov 0.0  }
  0x1c   :  { %648 = vpow2.f32 %v77_v23  ;;  %v95_v49 = vmul.f32 1.442695, %v64_v45 }
  0x1d   :  { %650 = vpow2.f32 %v79_v32 }
  0x1e   :  { %108 = vxpose.xlu0.b32.cont [4/16] %v36_v6, 128  ;;  %652 = vpow2.f32 %v81_v35 }
  0x1f   :  { %654 = vpow2.f32 %v83_v38 }
  0x20   :  { %656 = vpow2.f32 %v85_v41 }
  0x21   :  { %658 = vpow2.f32 %v87_v44 }
  0x22   :  { %109 = vxpose.xlu0.b32.cont [5/16] %v37_v10, 128  ;;  %660 = vpow2.f32 %v89_v46 }
  0x23   :  { %v637_v50 = vpop.eup %636  ;;  %662 = vpow2.f32 %v91_v47 }
  0x24   :  { %v639_v51 = vpop.eup %638  ;;  %664 = vpow2.f32 %v93_v48 }
  0x25   :  { %v641_v52 = vpop.eup %640  ;;  %v875_v53 = vpack.c.bf16 %v639_v51, %v637_v50  ;;  %666 = vpow2.f32 %v95_v49 }
  0x26   :  { %v643_v54 = vpop.eup %642  ;;  %110 = vxpose.xlu0.b32.cont [6/16] %v854_v11, 128 }
  0x27   :  { %v645_v55 = vpop.eup %644  ;;  %v878_v56 = vpack.c.bf16 %v643_v54, %v641_v52 }
  0x28   :  { %v647_v57 = vpop.eup %646 }
  0x29   :  { %v649_v58 = vpop.eup %648  ;;  %v880_v59 = vpack.c.bf16 %v647_v57, %v645_v55 }
  0x2a   :  { %v651_v60 = vpop.eup %650  ;;  %111 = vxpose.xlu0.b32.cont [7/16] %v856_v12, 128  ;;  %v195_v12 = vlaneseq }
  0x2b   :  { %v653_v61 = vpop.eup %652  ;;  %v883_v62 = vpack.c.bf16 %v651_v60, %v649_v58 }
  0x2c   :  { %v655_v63 = vpop.eup %654  ;;  %v196_v13 = vand.u32 127, %v195_v12 }
  0x2d   :  { %v657_v2 = vpop.eup %656  ;;  %v885_v3 = vpack.c.bf16 %v655_v63, %v653_v61 }
  0x2e   :  { %v659_v4 = vpop.eup %658  ;;  %112 = vxpose.xlu0.b32.cont [8/16] %v860_v22, 128  ;;  %vm197_vm0 = vcmp.lt.s32.totalorder %v196_v13, 64 }
  0x2f   :  { %v661_v5 = vpop.eup %660  ;;  %v888_v6 = vpack.c.bf16 %v659_v4, %v657_v2  ;;  %v898_v15 = vsel %vm197_vm0, 1.0, %v811_v14 }
  0x30   :  { %v663_v7 = vpop.eup %662 }
  0x31   :  { %v665_v8 = vpop.eup %664  ;;  %v890_v9 = vpack.c.bf16 %v663_v7, %v661_v5 }
  0x32   :  { %v667_v10 = vpop.eup %666  ;;  %113 = vxpose.xlu0.b32.cont [9/16] %v863_v25, 128 }
  0x33   :  { %v893_v11 = vpack.c.bf16 %v667_v10, %v665_v8 }
  0x36   :  { %114 = vxpose.xlu0.b32.cont [10/16] %v865_v26, 128 }
  0x3a   :  { %115 = vxpose.xlu0.b32.cont [11/16] %v867_v27, 128 }
  0x3e   :  { %116 = vxpose.xlu0.b32.cont [12/16] %v872_v31, 128 }
  0x42   :  { %117 = vxpose.xlu0.b32.cont [13/16] %v45_v34, 128 }
  0x46   :  { %118 = vxpose.xlu0.b32.cont [14/16] %v46_v37, 128 }
  0x4a   :  { %119 = vxpose.xlu0.b32.cont [15/16] %v47_v40, 128 }
  0x4e   :  { %120 = vxpose.xlu0.b32.end [16/16] %v48_v43, 128 }
  0x8e   :  { %v121_v16 = vpop.trf.xlu0 }
  0x8f   :  { %v137_v17 = vmul.f32 -1.0, %v121_v16 }
  0x91   :  { %v153_v18 = vmul.f32 1.442695, %v137_v17 }
  0x92   :  { %v122_v19 = vpop.trf.xlu0 }
  0x93   :  { %v138_v20 = vmul.f32 -1.0, %v122_v19  ;;  %668 = vpow2.f32 %v153_v18 }
  0x95   :  { %v155_v21 = vmul.f32 1.442695, %v138_v20 }
  0x96   :  { %v123_v22 = vpop.trf.xlu0 }
  0x97   :  { %670 = vpow2.f32 %v155_v21  ;;  %v139_v23 = vmul.f32 -1.0, %v123_v22 }
  0x99   :  { %v157_v24 = vmul.f32 1.442695, %v139_v23 }
  0x9a   :  { %v124_v25 = vpop.trf.xlu0 }
  0x9b   :  { %v140_v26 = vmul.f32 -1.0, %v124_v25  ;;  %672 = vpow2.f32 %v157_v24 }
  0x9d   :  { %v159_v27 = vmul.f32 1.442695, %v140_v26 }
  0x9e   :  { %v125_v28 = vpop.trf.xlu0 }
  0x9f   :  { %674 = vpow2.f32 %v159_v27  ;;  %v141_v29 = vmul.f32 -1.0, %v125_v28 }
  0xa0   :  { %v669_v32 = vpop.eup %668 }
  0xa1   :  { %v161_v30 = vmul.f32 1.442695, %v141_v29 }
  0xa2   :  { %v126_v31 = vpop.trf.xlu0 }
  0xa3   :  { %v142_v33 = vmul.f32 -1.0, %v126_v31  ;;  %676 = vpow2.f32 %v161_v30 }
  0xa4   :  { %v671_v34 = vpop.eup %670 }
  0xa5   :  { %v900_v35 = vpack.c.bf16 %v671_v34, %v669_v32  ;;  %v163_v36 = vmul.f32 1.442695, %v142_v33 }
  0xa6   :  { %v127_v37 = vpop.trf.xlu0 }
  0xa7   :  { %678 = vpow2.f32 %v163_v36  ;;  %v143_v38 = vmul.f32 -1.0, %v127_v37  ;;  %v916_v36 = vmov 0.0   ;;  %v1029_v37 = vmov %v847_v0 }
  0xa8   :  { %v673_v41 = vpop.eup %672 }
  0xa9   :  { %v165_v39 = vmul.f32 1.442695, %v143_v38 }
  0xaa   :  { %v128_v40 = vpop.trf.xlu0 }
  0xab   :  { %v144_v42 = vmul.f32 -1.0, %v128_v40  ;;  %680 = vpow2.f32 %v165_v39 }
  0xac   :  { %v675_v43 = vpop.eup %674 }
  0xad   :  { %v902_v44 = vpack.c.bf16 %v675_v43, %v673_v41  ;;  %v167_v45 = vmul.f32 1.442695, %v144_v42 }
  0xae   :  { %v129_v46 = vpop.trf.xlu0 }
  0xaf   :  { %682 = vpow2.f32 %v167_v45  ;;  %v145_v47 = vmul.f32 -1.0, %v129_v46 }
  0xb0   :  { %v677_v50 = vpop.eup %676 }
  0xb1   :  { %v169_v48 = vmul.f32 1.442695, %v145_v47 }
  0xb2   :  { %v130_v49 = vpop.trf.xlu0 }
  0xb3   :  { %v146_v51 = vmul.f32 -1.0, %v130_v49  ;;  %684 = vpow2.f32 %v169_v48 }
  0xb4   :  { %v679_v52 = vpop.eup %678 }
  0xb5   :  { %v904_v54 = vpack.c.bf16 %v679_v52, %v677_v50  ;;  %v171_v55 = vmul.f32 1.442695, %v146_v51 }
  0xb6   :  { %v131_v57 = vpop.trf.xlu0 }
  0xb7   :  { %686 = vpow2.f32 %v171_v55  ;;  %v147_v58 = vmul.f32 -1.0, %v131_v57 }
  0xb8   :  { %v681_v63 = vpop.eup %680 }
  0xb9   :  { %v173_v60 = vmul.f32 1.442695, %v147_v58 }
  0xba   :  { %v132_v61 = vpop.trf.xlu0 }
  0xbb   :  { %v148_v2 = vmul.f32 -1.0, %v132_v61  ;;  %688 = vpow2.f32 %v173_v60 }
  0xbc   :  { %v683_v4 = vpop.eup %682 }
  0xbd   :  { %v906_v5 = vpack.c.bf16 %v683_v4, %v681_v63  ;;  %v175_v7 = vmul.f32 1.442695, %v148_v2 }
  0xbe   :  { %v133_v8 = vpop.trf.xlu0 }
  0xbf   :  { %690 = vpow2.f32 %v175_v7  ;;  %v149_v10 = vmul.f32 -1.0, %v133_v8 }
  0xc0   :  { %v685_v14 = vpop.eup %684 }
  0xc1   :  { %v177_v12 = vmul.f32 1.442695, %v149_v10 }
  0xc2   :  { %v134_v13 = vpop.trf.xlu0 }
  0xc3   :  { %v150_v16 = vmul.f32 -1.0, %v134_v13  ;;  %692 = vpow2.f32 %v177_v12 }
  0xc4   :  { %v687_v17 = vpop.eup %686 }
  0xc5   :  { %v908_v18 = vpack.c.bf16 %v687_v17, %v685_v14  ;;  %v179_v19 = vmul.f32 1.442695, %v150_v16 }
  0xc6   :  { %v135_v20 = vpop.trf.xlu0 }
  0xc7   :  { %694 = vpow2.f32 %v179_v19  ;;  %v151_v21 = vmul.f32 -1.0, %v135_v20 }
  0xc8   :  { %v689_v24 = vpop.eup %688 }
  0xc9   :  { %v181_v22 = vmul.f32 1.442695, %v151_v21 }
  0xca   :  { %v136_v23 = vpop.trf.xlu0 }
  0xcb   :  { %v152_v25 = vmul.f32 -1.0, %v136_v23  ;;  %696 = vpow2.f32 %v181_v22 }
  0xcc   :  { %v691_v26 = vpop.eup %690 }
  0xcd   :  { %v910_v27 = vpack.c.bf16 %v691_v26, %v689_v24  ;;  %v183_v28 = vmul.f32 1.442695, %v152_v25 }
  0xcf   :  { %698 = vpow2.f32 %v183_v28 }
  0xd0   :  { %v693_v29 = vpop.eup %692 }
  0xd4   :  { %v695_v30 = vpop.eup %694 }
  0xd5   :  { %v912_v31 = vpack.c.bf16 %v695_v30, %v693_v29 }
  0xd8   :  { %v697_v32 = vpop.eup %696 }
  0xdc   :  { %v699_v33 = vpop.eup %698 }
  0xdd   :  { %v914_v34 = vpack.c.bf16 %v699_v33, %v697_v32 }
  0xde LB: > { %v812_v38 = vmov 0.0   ;;  %vm813_vm1 = vmmov 0   ;;  %v212_v39 = vpack.c.bf16 %v802_v37, %v802_v37  ;;  %vm403_vm2 = vcmask 1040384   ;;  %s430_s0 = sadd.s32 1, %s806_s0   ;;  %s806_s0 = sphi %s921_s0, %s430_s0   ;;  %v802_v37 = vphi %v1029_v37, %v396_v37   ;;  %v798_v36 = vphi %v916_v36, %v1030_v36  }
  0xdf   : > { %520 = vmatprep.subr.bf16.mxu0 %v812_v38  ;;  %536 = vmatprep.mubr.msk.bf16.mxu0 %vm813_vm1, %v812_v38  ;;  %p206_p5 = scmp.lt.s32.totalorder %s430_s0, 50 }
  0xe0   : > { %521 = vmatpush3.bf16.msra.mxu0 %v893_v11  ;;  %540 = vmatprep.subr.bf16.mxu1 %v812_v38 }
  0xe1   : > { %522 = vmatprep.subr.bf16.mxu0 %v812_v38  ;;  %541 = vmatpush3.bf16.msra.mxu1 %v914_v34 }
  0xe2   : > { %542 = vmatprep.subr.bf16.mxu1 %v812_v38  ;;  %556 = vmatprep.mubr.msk.bf16.mxu1 %vm813_vm1, %v812_v38 }
  0xe4   : > { %523 = vmatpush3.bf16.msra.mxu0 %v890_v9 }
  0xe5   : > { %524 = vmatprep.subr.bf16.mxu0 %v812_v38  ;;  %543 = vmatpush3.bf16.msra.mxu1 %v912_v31 }
  0xe6   : > { %544 = vmatprep.subr.bf16.mxu1 %v812_v38 }
  0xe8   : > { %525 = vmatpush3.bf16.msra.mxu0 %v888_v6 }
  0xe9   : > { %526 = vmatprep.subr.bf16.mxu0 %v812_v38  ;;  %545 = vmatpush3.bf16.msra.mxu1 %v910_v27 }
  0xea   : > { %546 = vmatprep.subr.bf16.mxu1 %v812_v38 }
  0xec   : > { %527 = vmatpush3.bf16.msra.mxu0 %v885_v3 }
  0xed   : > { %528 = vmatprep.subr.bf16.mxu0 %v812_v38  ;;  %547 = vmatpush3.bf16.msra.mxu1 %v908_v18 }
  0xee   : > { %548 = vmatprep.subr.bf16.mxu1 %v812_v38 }
  0xf0   : > { %529 = vmatpush3.bf16.msra.mxu0 %v883_v62 }
  0xf1   : > { %530 = vmatprep.subr.bf16.mxu0 %v812_v38  ;;  %549 = vmatpush3.bf16.msra.mxu1 %v906_v5 }
  0xf2   : > { %550 = vmatprep.subr.bf16.mxu1 %v812_v38 }
  0xf4   : > { %531 = vmatpush3.bf16.msra.mxu0 %v880_v59 }
  0xf5   : > { %532 = vmatprep.subr.bf16.mxu0 %v812_v38  ;;  %551 = vmatpush3.bf16.msra.mxu1 %v904_v54 }
  0xf6   : > { %552 = vmatprep.subr.bf16.mxu1 %v812_v38 }
  0xf8   : > { %533 = vmatpush3.bf16.msra.mxu0 %v878_v56 }
  0xf9   : > { %534 = vmatprep.subr.bf16.mxu0 %v812_v38  ;;  %553 = vmatpush3.bf16.msra.mxu1 %v902_v44 }
  0xfa   : > { %554 = vmatprep.subr.bf16.mxu1 %v812_v38 }
  0xfc   : > { %535 = vmatpush3.bf16.msra.mxu0 %v875_v53 }
  0xfd   : > { %555 = vmatpush3.bf16.msra.mxu1 %v900_v35  ;;  %560 = vmatprep.subr.bf16.mxu0 %v812_v38 }
  0xfe   : > { %580 = vmatprep.subr.bf16.mxu1 %v812_v38 }
  0xff   : > { %537 = vmatmul.mubr.bf16.vlgmr.msra.gmra.mxu0 %v212_v39 }
 0x100   : > { %561 = vmatpush3.bf16.msra.mxu0 %v893_v11  ;;  %576 = vmatprep.mubr.msk.bf16.mxu0 %vm813_vm1, %v812_v38 }
 0x101   : > { %562 = vmatprep.subr.bf16.mxu0 %v812_v38 }
 0x104   : > { %563 = vmatpush3.bf16.msra.mxu0 %v890_v9 }
 0x105   : > { %564 = vmatprep.subr.bf16.mxu0 %v812_v38 }
 0x108   : > { %565 = vmatpush3.bf16.msra.mxu0 %v888_v6 }
 0x109   : > { %566 = vmatprep.subr.bf16.mxu0 %v812_v38 }
 0x10c   : > { %567 = vmatpush3.bf16.msra.mxu0 %v885_v3 }
 0x10d   : > { %568 = vmatprep.subr.bf16.mxu0 %v812_v38 }
 0x110   : > { %569 = vmatpush3.bf16.msra.mxu0 %v883_v62 }
 0x111   : > { %570 = vmatprep.subr.bf16.mxu0 %v812_v38 }
 0x114   : > { %571 = vmatpush3.bf16.msra.mxu0 %v880_v59 }
 0x115   : > { %572 = vmatprep.subr.bf16.mxu0 %v812_v38 }
 0x118   : > { %573 = vmatpush3.bf16.msra.mxu0 %v878_v56 }
 0x119   : > { %574 = vmatprep.subr.bf16.mxu0 %v812_v38 }
 0x11c   : > { %575 = vmatpush3.bf16.msra.mxu0 %v875_v53 }
 0x1bf   : > { %v247_v40 = vpop.f32.mrf.mxu0 }
 0x1c0   : > { %v248_v41 = vadd.f32 1e-07, %v247_v40 }
 0x1c1   : > { %v538_v42 = vpop.f32.mrf.mxu0 }
 0x1c2   : > { %700 = vlog2.f32 %v248_v41 }
 0x1c3   : > { %v250_v43 = vpop.f32.mrf.mxu0 }
 0x1c5   : > { %v539_v45 = vpop.f32.mrf.mxu0 }
 0x1cf   : > { %v701_v46 = vpop.eup %700 }
 0x1d0   : > { %v254_v47 = vmul.f32 0.6931472, %v701_v46 }
 0x1d2   : > { %v255_v48 = vsub.f32 0.0, %v254_v47 }
 0x1d4   : > { %v256_v49 = vmul.f32 0.5, %v255_v48 }
 0x1d6   : > { %v257_v50 = vmul.f32 1.442695, %v256_v49 }
 0x1d8   : > { %702 = vpow2.f32 %v257_v50 }
 0x1e5   : > { %v703_v51 = vpop.eup %702 }
 0x1e6   : > { %v259_v52 = vmul.f32 %v703_v51, %v852_v1 }
 0x1e8   : > { %v260_v55 = vpack.c.bf16 %v259_v52, %v259_v52 }
 0x1ea   : > { %557 = vmatmul.mubr.bf16.vlgmr.msra.gmra.mxu1 %v260_v55 }
 0x1eb   : > { %581 = vmatpush3.bf16.msra.mxu1 %v914_v34  ;;  %596 = vmatprep.mubr.msk.bf16.mxu1 %vm813_vm1, %v812_v38 }
 0x1ec   : > { %582 = vmatprep.subr.bf16.mxu1 %v812_v38 }
 0x1ef   : > { %583 = vmatpush3.bf16.msra.mxu1 %v912_v31 }
 0x1f0   : > { %584 = vmatprep.subr.bf16.mxu1 %v812_v38 }
 0x1f3   : > { %585 = vmatpush3.bf16.msra.mxu1 %v910_v27 }
 0x1f4   : > { %586 = vmatprep.subr.bf16.mxu1 %v812_v38 }
 0x1f7   : > { %587 = vmatpush3.bf16.msra.mxu1 %v908_v18 }
 0x1f8   : > { %588 = vmatprep.subr.bf16.mxu1 %v812_v38 }
 0x1fb   : > { %589 = vmatpush3.bf16.msra.mxu1 %v906_v5 }
 0x1fc   : > { %590 = vmatprep.subr.bf16.mxu1 %v812_v38 }
 0x1ff   : > { %591 = vmatpush3.bf16.msra.mxu1 %v904_v54 }
 0x200   : > { %592 = vmatprep.subr.bf16.mxu1 %v812_v38 }
 0x203   : > { %593 = vmatpush3.bf16.msra.mxu1 %v902_v44 }
 0x204   : > { %594 = vmatprep.subr.bf16.mxu1 %v812_v38 }
 0x207   : > { %595 = vmatpush3.bf16.msra.mxu1 %v900_v35 }
 0x2aa   : > { %v295_v57 = vpop.f32.mrf.mxu1 }
 0x2ab   : > { %v296_v58 = vadd.f32 1e-07, %v295_v57 }
 0x2ac   : > { %v558_v60 = vpop.f32.mrf.mxu1 }
 0x2ad   : > { %704 = vrcp.f32 %v296_v58 }
 0x2ae   : > { %706 = vlog2.f32 %v296_v58  ;;  %v298_v61 = vpop.f32.mrf.mxu1 }
 0x2b0   : > { %v559_v63 = vpop.f32.mrf.mxu1 }
 0x2ba   : > { %v705_v2 = vpop.eup %704 }
 0x2bb   : > { %v707_v4 = vpop.eup %706  ;;  %v302_v7 = vmul.f32 %v705_v2, %v847_v0 }
 0x2bc   : > { %v304_v8 = vmul.f32 0.6931472, %v707_v4 }
 0x2bd   : > { %v306_v10 = vpack.c.bf16 %v302_v7, %v302_v7 }
 0x2be   : > { %v305_v12 = vsub.f32 0.0, %v304_v8 }
 0x2bf   : > { %577 = vmatmul.mubr.bf16.vlgmr.msra.gmra.mxu0 %v306_v10 }
 0x2c0   : > { %v400_v13 = vsub.f32 %v305_v12, %v798_v36 }
 0x2c2   : > { %v401_v14 = vand.u32 2147483647, %v400_v13 }
 0x2c4   : > { %v402_v16 = vmul.f32 %v898_v15, %v401_v14 }
 0x2c6   : > { %v404_v17 = vsel %vm403_vm2, %v402_v16, 0.0 }
 0x2c7   : > { %405 = vadd.xlane.f32.xlu0 %v404_v17 }
 0x350   : > { %v406_v19 = vpop.xlane.xlu0 %405 }
 0x351   : > { %v407_v20 = vrot.slane %v406_v19, 4 }
 0x353   : > { %v408_v21 = vadd.f32 %v407_v20, %v406_v19 }
 0x355   : > { %v409_v22 = vrot.slane %v408_v21, 2 }
 0x357   : > { %v410_v23 = vadd.f32 %v409_v22, %v408_v21 }
 0x359   : > { %v411_v24 = vrot.slane %v410_v23, 1 }
 0x35b   : > { %v412_v25 = vadd.f32 %v411_v24, %v410_v23 }
 0x35d   : > { %600 = vpush %v412_v25 }
 0x37f   : > { %v341_v26 = vpop.f32.mrf.mxu0 }
 0x380   : > { %v342_v28 = vadd.f32 1e-07, %v341_v26 }
 0x381   : > { %v578_v29 = vpop.f32.mrf.mxu0 }
 0x382   : > { %708 = vlog2.f32 %v342_v28 }
 0x383   : > { %v344_v30 = vpop.f32.mrf.mxu0 }
 0x385   : > { %v579_v32 = vpop.f32.mrf.mxu0 }
 0x38e   : > { %s601_s1 = spop %600 }
 0x38f   : > { %v709_v33 = vpop.eup %708  ;;  %s414_s2 = smul.f32 0.015625, %s601_s1 }
 0x390   : > { %v348_v36 = vmul.f32 0.6931472, %v709_v33 }
 0x392   : > { %v349_v37 = vsub.f32 0.0, %v348_v36 }
 0x394   : > { %v350_v38 = vmul.f32 0.5, %v349_v37 }
 0x396   : > { %v351_v39 = vmul.f32 1.442695, %v350_v38 }
 0x398   : > { %710 = vpow2.f32 %v351_v39 }
 0x3a5   : > { %v711_v40 = vpop.eup %710 }
 0x3a6   : > { %v353_v41 = vmul.f32 %v711_v40, %v852_v1 }
 0x3a8   : > { %v354_v42 = vpack.c.bf16 %v353_v41, %v353_v41 }
 0x3aa   : > { %597 = vmatmul.mubr.bf16.vlgmr.msra.gmra.mxu1 %v354_v42 }
 0x46a   : > { %v389_v43 = vpop.f32.mrf.mxu1 }
 0x46b   : > { %v390_v45 = vadd.f32 1e-07, %v389_v43 }
 0x46c   : > { %v598_v46 = vpop.f32.mrf.mxu1 }
 0x46d   : > { %712 = vrcp.f32 %v390_v45 }
 0x46e   : > { %714 = vlog2.f32 %v390_v45  ;;  %v392_v47 = vpop.f32.mrf.mxu1 }
 0x470   : > { %v599_v48 = vpop.f32.mrf.mxu1 }
 0x47a   : > { %v713_v49 = vpop.eup %712 }
 0x47b   : > { %v715_v50 = vpop.eup %714  ;;  %v396_v37 = vmul.f32 %v713_v49, %v847_v0  }
 0x47c   : > { %v398_v51 = vmul.f32 0.6931472, %v715_v50 }
 0x47e   : > { %v399_v52 = vsub.f32 0.0, %v398_v51  }
 0x480   : > { %v415_v55 = vsub.f32 %v399_v52, %v305_v12  ;;  %v1030_v36 = vmov %v399_v52 }
 0x482   : > { %v416_v57 = vand.u32 2147483647, %v415_v55 }
 0x484   : > { %v417_v58 = vmul.f32 %v898_v15, %v416_v57 }
 0x486   : > { %v418_v60 = vsel %vm403_vm2, %v417_v58, 0.0 }
 0x487   : > { %419 = vadd.xlane.f32.xlu0 %v418_v60 }
 0x510   : > { %v420_v61 = vpop.xlane.xlu0 %419 }
 0x511   : > { %v421_v63 = vrot.slane %v420_v61, 4 }
 0x513   : > { %v422_v2 = vadd.f32 %v421_v63, %v420_v61 }
 0x515   : > { %v423_v4 = vrot.slane %v422_v2, 2 }
 0x517   : > { %v424_v7 = vadd.f32 %v423_v4, %v422_v2 }
 0x519   : > { %v425_v8 = vrot.slane %v424_v7, 1 }
 0x51b   : > { %v426_v10 = vadd.f32 %v425_v8, %v424_v7 }
 0x51d   : > { %602 = vpush %v426_v10 }
 0x54e   : > { %s603_s26 = spop %602 }
 0x54f   : > { %s428_s27 = smul.f32 0.015625, %s603_s26 }
 0x551   : > { %s429_s28 = smin.f32 %s428_s27, %s414_s2 }
 0x552   : > { %p207_p6 = scmp.ge.f32.partialorder %s429_s28, 0.0005 }
 0x554   : > { %p208_p7 = pnand %p207_p6, %p206_p5 }
 0x555   :  { %v431_v12 = vsub.f32 (%p208_p7), 0.0, %v350_v38  ;;  %436 = vst [vmem:[#allocation6] sm:$0x1] (%p208_p7), %v399_v52  ;;  %s814_s29 = smov (%p208_p7), [#allocation6]  }
 0x556   :  { %211 = sbr.rel (!%p208_p7) target bundleno = 222 (0xde), region = 51  ;;  %s453_s30 = sshll.u32 (%p208_p7), %s814_s29, 4  ;;  %s454_s30 = int_to_ptr.vmem [resolvable:$true] %s453_s30 }
 0x557   :  { %v432_v13 = vmul.f32 (%p208_p7), 1.442695, %v431_v12  ;;  %s738_s5 = scalar_lea.vmem (%p208_p7), %s454_s30, 16  ;;  %s742_s6 = scalar_lea.vmem (%p208_p7), %s454_s30, 32 }
 0x558   :  { %p739_p8 = scmp.ne.s32.totalorder (%p208_p7), %s454_s30, %s738_s5  ;;  %p743_p9 = scmp.lt.s32.totalorder (%p208_p7), %s454_s30, %s454_s30 }
 0x559   :  { %p744_p10 = scmp.lt.s32.totalorder (%p208_p7), %s742_s6, %s738_s5 }
 0x55b   :  { %p745_p11 = por %p744_p10, %p743_p9 }
 0x55d   :  { %p746_p12 = pnand %p745_p11, %p739_p8 }
 0x55f   :  { %749 = shalt.err (!%p746_p12)
}
 0x560   :  { %456 = dma.vmem_to_hbm [thread:$0]  %s454_s30, 16, %s1028_s4, [#allocation7]   ;;  %716 = vpow2.f32 %v432_v13 }
 0x561   :  { %s815_s9 = smov [#allocation5]  }
 0x562   :  { %s443_s10 = sshll.u32 %s815_s9, 4  ;;  %s444_s10 = int_to_ptr.vmem [resolvable:$true] %s443_s10 }
 0x563   :  { %s758_s11 = scalar_lea.vmem %s444_s10, 16  ;;  %s762_s12 = scalar_lea.vmem %s444_s10, 32 }
 0x564   :  { %p759_p13 = scmp.ne.s32.totalorder %s444_s10, %s758_s11  ;;  %p763_p0 = scmp.lt.s32.totalorder %s444_s10, %s444_s10 }
 0x565   :  { %p764_p1 = scmp.lt.s32.totalorder %s762_s12, %s758_s11 }
 0x567   :  { %p765_p2 = por %p764_p1, %p763_p0 }
 0x569   :  { %p766_p3 = pnand %p765_p2, %p759_p13 }
 0x56d   :  { %v717_v0 = vpop.eup %716 }
 0x56e   :  { %v434_v1 = vsub.f32 1.0, %v717_v0 }
 0x570   :  { %435 = vst [vmem:[#allocation5] sm:$0x1] %v434_v1 }
 0x571   :  { %769 = shalt.err (!%p766_p3)
}
 0x572   :  { %446 = dma.vmem_to_hbm [thread:$0]  %s444_s10, 16, %s1027_s3, [#allocation4]  }
 0x573   :  { %792 = dma.done.wait [#allocation4], 16  }
 0x574   :  { %793 = vsyncadd [#allocation4], 4294967280 }
 0x575   :  { %794 = dma.done.wait [#allocation7], 16  }
 0x576   :  { %795 = vsyncadd [#allocation7], 4294967280 }
 0x577   :  { %463 = vsyncpa [#allocation3], 1 }
 0x578   :  { %464 = vsyncpa [#allocation4], 1 }
 0x579   :  { %465 = vsyncpa [#allocation7], 1 }

</bundles_post_ra>
